<compile_context>
chip_gen: v5e
topology: v5e:2x2
jax: 0.10.0
libtpu: 0.0.40
codegen_flags: <defaults>
</compile_context>

<pallas_src>
import functools

import jax
import jax.numpy as jnp
from jax.experimental import pallas as pl
from jax.experimental.pallas import tpu as pltpu


def _round_up(x, m):
    return (x + m - 1) // m * m


# ---------------------------------------------------------------------------
# Kernel
# ---------------------------------------------------------------------------
def encoder_decoder_kernel(
    x0_ref, w0_ref, wc12_ref, w1_ref, w2_ref, wm_ref,
    t0_ref, t1_ref, t2_ref, bm_ref,
    ym_ref,
    h_ref,
):
    """Grid = (batch tiles, mean-head N tiles).

    Hidden stack (3x Linear+foldedBN+ReLU with cov injection) runs once per
    batch tile (n == 0) into VMEM scratch; each grid step emits one N tile of
    the mean head.
    """
    f32 = jnp.float32
    cdt = w0_ref.dtype
    C = wc12_ref.shape[0]
    H = w1_ref.shape[0]

    @pl.when(pl.program_id(1) == 0)
    def _():
        x0 = x0_ref[...]                      # [cov | x], cov in first C lanes
        # Layer 0: BN folded into w0/t0; Dropout identity in eval.
        h = jnp.dot(x0, w0_ref[...], preferred_element_type=f32) + t0_ref[...]
        h = jnp.maximum(h, 0.0)
        # Covariate injection for layers 1 & 2: one fused dot, lane-aligned split.
        c12 = jnp.dot(x0[:, :C], wc12_ref[...], preferred_element_type=f32)
        # Layer 1
        h = (jnp.dot(h.astype(cdt), w1_ref[...], preferred_element_type=f32)
             + c12[:, :H] + t1_ref[...])
        h = jnp.maximum(h, 0.0)
        # Layer 2
        h = (jnp.dot(h.astype(cdt), w2_ref[...], preferred_element_type=f32)
             + c12[:, H:] + t2_ref[...])
        h = jnp.maximum(h, 0.0)
        h_ref[...] = h.astype(h_ref.dtype)

    # Mean head (current N tile) + torch.nan_to_num semantics
    # (nan -> 0, +/-inf -> finite max/min).
    ym = jnp.dot(h_ref[...], wm_ref[...], preferred_element_type=f32) + bm_ref[...]
    ym = jnp.where(jnp.isnan(ym), jnp.zeros_like(ym), ym)
    big = jnp.finfo(f32).max
    ym_ref[...] = jnp.clip(ym, -big, big).astype(ym_ref.dtype)


# ---------------------------------------------------------------------------
# Wrapper
# ---------------------------------------------------------------------------
@functools.partial(jax.jit, static_argnames=("tile_batch",))
def encoder_decoder_forward(x, cov, params, tile_batch=None):
    f32 = jnp.float32
    batch, n_input = x.shape
    n_cov = cov.shape[1]

    K0, H = params["w0"].shape
    C = params["wc12"].shape[0]
    N = params["wm"].shape[1]
    n_output = params["var_param"].shape[1]
    cdt = params["w0"].dtype
    itm = jnp.dtype(cdt).itemsize

    # ---- batch tile --------------------------------------------------------
    if tile_batch is None:
        if batch < 256:
            tb = max(16, _round_up(batch, 16))
        elif batch < 512:
            tb = 128          # keep >= 2 tiles so both v7x TensorCores work
        elif batch < 2048:
            tb = 256
        else:
            tb = 512          # large batches: fewer grid steps (v5e/v6e)
    else:
        tb = max(16, _round_up(tile_batch, 16))   # 16: bf16 sublane packing
    bp = _round_up(batch, tb)
    grid_b = bp // tb

    # ---- mean-head N tile --------------------------------------------------
    if N % 512 == 0:
        tn = 512
    elif N % 256 == 0:
        tn = 256
    else:
        tn = 128
    grid_n = N // tn

    # ---- streamed input: [cov | x], cov in the first C (lane-aligned) lanes.
    x0 = jnp.zeros((bp, K0), cdt)
    x0 = x0.at[:batch, :n_cov].set(cov.astype(cdt))
    x0 = x0.at[:batch, C:C + n_input].set(x.astype(cdt))

    # ---- VMEM budget / limit -----------------------------------------------
    w_res = (K0 * H + C * 2 * H + 2 * H * H) * itm + 3 * H * 4   # Buffered(1)
    w_tile = 2 * (H * tn * itm + tn * 4)                          # wm/bm (dbl buf)
    streams = 2 * tb * K0 * itm + 2 * tb * tn * 4                 # x0 in, ym out
    scratch = tb * H * itm
    vmem_need = w_res + w_tile + streams + scratch
    try:
        vmem_cap = int(pltpu.get_tpu_info().vmem_capacity_bytes)
    except Exception:
        vmem_cap = 64 << 20                      # conservative (v7x physical)
    vmem_limit = int(min(max(vmem_need + (4 << 20), 16 << 20),
                         int(vmem_cap * 0.85)))

    flops = 2 * bp * (K0 * H + C * 2 * H + 2 * H * H + H * N)
    bytes_accessed = (bp * K0 * itm + bp * N * 4
                      + (K0 * H + C * 2 * H + 2 * H * H + H * N) * itm
                      + (3 * H + N) * 4)

    row_b = lambda b, n: (b, 0)   # streamed along batch, constant across N
    const = lambda b, n: (0, 0)   # resident in VMEM
    head = lambda b, n: (0, n)    # mean-head N tiles
    res = dict(pipeline_mode=pl.Buffered(1))   # single-buffer resident weights

    in_specs = [
        pl.BlockSpec((tb, K0), row_b),            # x0   (streamed)
        pl.BlockSpec((K0, H), const, **res),      # w0   (resident)
        pl.BlockSpec((C, 2 * H), const, **res),   # wc12 (resident, fused)
        pl.BlockSpec((H, H), const, **res),       # w1
        pl.BlockSpec((H, H), const, **res),       # w2
        pl.BlockSpec((H, tn), head),              # wm   (N-tiled)
        pl.BlockSpec((1, H), const, **res),       # t0
        pl.BlockSpec((1, H), const, **res),       # t1
        pl.BlockSpec((1, H), const, **res),       # t2
        pl.BlockSpec((1, tn), head),              # bm   (N-tiled)
    ]

    ym_pad = pl.pallas_call(
        encoder_decoder_kernel,
        out_shape=jax.ShapeDtypeStruct((bp, N), f32),
        grid=(grid_b, grid_n),
        in_specs=in_specs,
        out_specs=pl.BlockSpec((tb, tn), lambda b, n: (b, n)),
        scratch_shapes=[pltpu.VMEM((tb, H), cdt)],
        compiler_params=pltpu.CompilerParams(
            dimension_semantics=("parallel", "arbitrary"),
            vmem_limit_bytes=vmem_limit,
        ),
        cost_estimate=pl.CostEstimate(
            flops=flops, transcendentals=0, bytes_accessed=bytes_accessed),
    )(x0,
      params["w0"], params["wc12"], params["w1"], params["w2"], params["wm"],
      params["t0"], params["t1"], params["t2"], params["bm"])

    # TODO(synk): if downstream tolerates bf16 / the padded (bp, N) layout,
    #             emit that directly and skip this slice (halves writeback).
    y_m = ym_pad[:batch, :n_output]

    # Variance head (mode='feature'): x-independent -> plain JAX.
    y_v = jnp.broadcast_to(
        jnp.exp(params["var_param"].astype(f32)) + jnp.float32(1e-4),
        (batch, n_output))
    return {"y_m": y_m, "y_v": y_v}


# ---------------------------------------------------------------------------
# Parameter construction (torch-like raw params) and packing (fold + pad + cast)
# ---------------------------------------------------------------------------
def init_params(key, n_input, n_output, n_cov, n_hidden, n_layers=3):
    """Deterministic synthetic parameters in PyTorch-like layout."""
    keys = iter(jax.random.split(key, 8 * n_layers + 8))

    def linear(fan_out, fan_in):
        bound = 1.0 / (fan_in ** 0.5)
        w = jax.random.uniform(next(keys), (fan_out, fan_in), jnp.float32,
                               -bound, bound)
        b = jax.random.uniform(next(keys), (fan_out,), jnp.float32,
                               -bound, bound)
        return w, b

    layers = []
    in_dim = n_input
    for _ in range(n_layers):
        w, b = linear(n_hidden, in_dim + n_cov)
        gamma = 1.0 + 0.1 * jax.random.normal(next(keys), (n_hidden,), jnp.float32)
        beta = 0.1 * jax.random.normal(next(keys), (n_hidden,), jnp.float32)
        mean = 0.1 * jax.random.normal(next(keys), (n_hidden,), jnp.float32)
        var = 1.0 + 0.1 * jax.random.uniform(next(keys), (n_hidden,), jnp.float32)
        layers.append(dict(w=w, b=b, gamma=gamma, beta=beta, mean=mean, var=var))
        in_dim = n_hidden

    wm, bm = linear(n_output, n_hidden)
    # torch inits var_param to zeros; use small random values for a non-trivial test.
    var_param = 0.1 * jax.random.normal(next(keys), (1, n_output), jnp.float32)
    return dict(layers=layers, wm=wm, bm=bm, var_param=var_param)


def pack_params(raw, n_input, n_cov, n_hidden, n_output,
                compute_dtype=jnp.bfloat16, bn_eps=1e-3):
    """Fold eval-mode BatchNorm into the Linear weights, lane-pad to 128, cast.

    Layer-0 rows are reordered to [cov rows ; x rows] to match the [cov | x]
    input packing; layer-1/2 covariate weights are fused into one (C, 2H) block.
    """
    assert len(raw["layers"]) == 3, "kernel is specialized to n_layers=3 (default)"
    C = _round_up(max(n_cov, 1), 128)
    Kx = _round_up(n_input, 128)
    K0 = C + Kx
    H = _round_up(n_hidden, 128)
    N = _round_up(n_output, 128)

    def fold(layer):
        scale = layer["gamma"] / jnp.sqrt(layer["var"] + bn_eps)
        shift = layer["beta"] - layer["mean"] * scale
        wf = layer["w"].T * scale[None, :]          # (in, out), BN-scaled
        tf = layer["b"] * scale + shift             # (out,)
        return wf, tf

    def pad2(a, r, c):
        return jnp.zeros((r, c), a.dtype).at[:a.shape[0], :a.shape[1]].set(a)

    w0f, t0 = fold(raw["layers"][0])   # (n_input + n_cov, n_hidden)
    w1f, t1 = fold(raw["layers"][1])   # (n_hidden + n_cov, n_hidden)
    w2f, t2 = fold(raw["layers"][2])

    w0 = jnp.zeros((K0, H), jnp.float32)
    w0 = w0.at[:n_cov, :n_hidden].set(w0f[n_input:])          # cov rows first
    w0 = w0.at[C:C + n_input, :n_hidden].set(w0f[:n_input])   # then x rows

    wc12 = jnp.zeros((C, 2 * H), jnp.float32)
    wc12 = wc12.at[:n_cov, :n_hidden].set(w1f[n_hidden:])
    wc12 = wc12.at[:n_cov, H:H + n_hidden].set(w2f[n_hidden:])

    return {
        "w0": w0.astype(compute_dtype),
        "wc12": wc12.astype(compute_dtype),
        "w1": pad2(w1f[:n_hidden], H, H).astype(compute_dtype),
        "w2": pad2(w2f[:n_hidden], H, H).astype(compute_dtype),
        "wm": pad2(raw["wm"].T, H, N).astype(compute_dtype),
        "t0": pad2(t0[None, :], 1, H),   # f32 epilogue params
        "t1": pad2(t1[None, :], 1, H),
        "t2": pad2(t2[None, :], 1, H),
        "bm": pad2(raw["bm"][None, :], 1, N),
        "var_param": raw["var_param"],
    }


def reference_forward(x, cov, raw, bn_eps=1e-3):
    """Pure-JAX f32 reference mirroring the PyTorch module (eval mode)."""
    h = x
    for layer in raw["layers"]:
        inp = jnp.concatenate([h, cov], axis=-1)
        z = inp @ layer["w"].T + layer["b"]
        scale = layer["gamma"] / jnp.sqrt(layer["var"] + bn_eps)
        z = (z - layer["mean"]) * scale + layer["beta"]
        h = jnp.maximum(z, 0.0)
    y_m = jnp.nan_to_num(h @ raw["wm"].T + raw["bm"])
    y_v = jnp.exp(raw["var_param"]) + 1e-4
    y_v = jnp.broadcast_to(y_v, (x.shape[0], y_v.shape[1]))
    return {"y_m": y_m, "y_v": y_v}


# ---------------------------------------------------------------------------
if __name__ == "__main__":
    # Small shapes consistent with the module; batch chosen to exercise the
    # batch grid (tile_batch=16 -> padded batch 48, 3 batch tiles x 1 N tile).
    batch, n_input, n_cov, n_hidden, n_output = 40, 32, 4, 32, 16

    key = jax.random.PRNGKey(0)
    k_x, k_cov, k_params = jax.random.split(key, 3)

    x = jax.random.normal(k_x, (batch, n_input), jnp.float32)
    cov = jax.random.normal(k_cov, (batch, n_cov), jnp.float32)

    raw = init_params(k_params, n_input, n_output, n_cov, n_hidden)
    packed = pack_params(raw, n_input, n_cov, n_hidden, n_output)

    out = encoder_decoder_forward(x, cov, packed, tile_batch=16)
    jax.block_until_ready(out)

    ref = reference_forward(x, cov, raw)

    assert out["y_m"].shape == (batch, n_output)
    assert out["y_v"].shape == (batch, n_output)
    assert bool(jnp.all(out["y_v"] > 0.0))
    # bf16 matmuls with f32 accumulation vs f32 reference -> loose tolerance.
    assert bool(jnp.allclose(out["y_m"], ref["y_m"], atol=5e-2, rtol=5e-2))
    assert bool(jnp.allclose(out["y_v"], ref["y_v"], atol=1e-5, rtol=1e-5))
    print("KERNEL_OK")
</pallas_src>

<mosaic_0001>
module attributes {stable_mosaic.version = 11 : i64} {
  func.func @encoder_decoder_kernel(%arg0: i32, %arg1: i32, %arg2: memref<16x256xbf16, #tpu.memory_space<vmem>>, %arg3: memref<256x128xbf16, #tpu.memory_space<vmem>>, %arg4: memref<128x256xbf16, #tpu.memory_space<vmem>>, %arg5: memref<128x128xbf16, #tpu.memory_space<vmem>>, %arg6: memref<128x128xbf16, #tpu.memory_space<vmem>>, %arg7: memref<128x128xbf16, #tpu.memory_space<vmem>>, %arg8: memref<1x128xf32, #tpu.memory_space<vmem>>, %arg9: memref<1x128xf32, #tpu.memory_space<vmem>>, %arg10: memref<1x128xf32, #tpu.memory_space<vmem>>, %arg11: memref<1x128xf32, #tpu.memory_space<vmem>>, %arg12: memref<16x128xf32, #tpu.memory_space<vmem>>, %arg13: memref<16x128xbf16, #tpu.memory_space<vmem>>) attributes {dimension_semantics = [#tpu.dimension_semantics<parallel>, #tpu.dimension_semantics<arbitrary>], iteration_bounds = array<i64: 3, 1>, scalar_prefetch = 0 : i64, scratch_operands = 1 : i64, tpu.core_type = #tpu.core_type<tc>, window_params = [{transform_indices = @transform_0, window_bounds = array<i64: 16, 256>}, {pipeline_mode = #tpu.pipeline_mode<synchronous>, transform_indices = @transform_1, window_bounds = array<i64: 256, 128>}, {pipeline_mode = #tpu.pipeline_mode<synchronous>, transform_indices = @transform_2, window_bounds = array<i64: 128, 256>}, {pipeline_mode = #tpu.pipeline_mode<synchronous>, transform_indices = @transform_3, window_bounds = array<i64: 128, 128>}, {pipeline_mode = #tpu.pipeline_mode<synchronous>, transform_indices = @transform_4, window_bounds = array<i64: 128, 128>}, {transform_indices = @transform_5, window_bounds = array<i64: 128, 128>}, {pipeline_mode = #tpu.pipeline_mode<synchronous>, transform_indices = @transform_6, window_bounds = array<i64: 1, 128>}, {pipeline_mode = #tpu.pipeline_mode<synchronous>, transform_indices = @transform_7, window_bounds = array<i64: 1, 128>}, {pipeline_mode = #tpu.pipeline_mode<synchronous>, transform_indices = @transform_8, window_bounds = array<i64: 1, 128>}, {transform_indices = @transform_9, window_bounds = array<i64: 1, 128>}, {transform_indices = @transform_10, window_bounds = array<i64: 16, 128>}]} {
    %c0_i32 = arith.constant 0 : i32
    %0 = arith.cmpi eq, %arg1, %c0_i32 : i32
    %1 = arith.extui %0 : i1 to i32
    %c0_i32_0 = arith.constant 0 : i32
    %2 = arith.cmpi ne, %1, %c0_i32_0 : i32
    scf.if %2 {
      %c0_11 = arith.constant 0 : index
      %c0_12 = arith.constant 0 : index
      %17 = vector.load %arg2[%c0_11, %c0_12] : memref<16x256xbf16, #tpu.memory_space<vmem>>, vector<16x256xbf16>
      %c0_13 = arith.constant 0 : index
      %c0_14 = arith.constant 0 : index
      %18 = vector.load %arg3[%c0_13, %c0_14] : memref<256x128xbf16, #tpu.memory_space<vmem>>, vector<256x128xbf16>
      %cst_15 = arith.constant dense<0.000000e+00> : vector<16x128xf32>
      %19 = tpu.matmul %17, %18, %cst_15 {dimension_numbers = #tpu.dot_dimension_numbers<[1], [0], [0], [1], [0, 0, 1, 1], [], []>} : vector<16x256xbf16>, vector<256x128xbf16>, vector<16x128xf32> -> vector<16x128xf32>
      %c0_16 = arith.constant 0 : index
      %c0_17 = arith.constant 0 : index
      %20 = vector.load %arg8[%c0_16, %c0_17] : memref<1x128xf32, #tpu.memory_space<vmem>>, vector<1x128xf32>
      %21 = vector.broadcast %20 : vector<1x128xf32> to vector<16x128xf32>
      %22 = arith.addf %19, %21 : vector<16x128xf32>
      %cst_18 = arith.constant 0.000000e+00 : f32
      %23 = vector.broadcast %cst_18 : f32 to vector<16x128xf32>
      %24 = arith.maximumf %22, %23 : vector<16x128xf32>
      %25 = vector.extract_strided_slice %17 {offsets = [0, 0], sizes = [16, 128], strides = [1, 1]} : vector<16x256xbf16> to vector<16x128xbf16>
      %c0_19 = arith.constant 0 : index
      %c0_20 = arith.constant 0 : index
      %26 = vector.load %arg4[%c0_19, %c0_20] : memref<128x256xbf16, #tpu.memory_space<vmem>>, vector<128x256xbf16>
      %cst_21 = arith.constant dense<0.000000e+00> : vector<16x256xf32>
      %27 = tpu.matmul %25, %26, %cst_21 {dimension_numbers = #tpu.dot_dimension_numbers<[1], [0], [0], [1], [0, 0, 1, 1], [], []>} : vector<16x128xbf16>, vector<128x256xbf16>, vector<16x256xf32> -> vector<16x256xf32>
      %28 = arith.truncf %24 : vector<16x128xf32> to vector<16x128xbf16>
      %c0_22 = arith.constant 0 : index
      %c0_23 = arith.constant 0 : index
      %29 = vector.load %arg5[%c0_22, %c0_23] : memref<128x128xbf16, #tpu.memory_space<vmem>>, vector<128x128xbf16>
      %cst_24 = arith.constant dense<0.000000e+00> : vector<16x128xf32>
      %30 = tpu.matmul %28, %29, %cst_24 {dimension_numbers = #tpu.dot_dimension_numbers<[1], [0], [0], [1], [0, 0, 1, 1], [], []>} : vector<16x128xbf16>, vector<128x128xbf16>, vector<16x128xf32> -> vector<16x128xf32>
      %31 = vector.extract_strided_slice %27 {offsets = [0, 0], sizes = [16, 128], strides = [1, 1]} : vector<16x256xf32> to vector<16x128xf32>
      %32 = arith.addf %30, %31 : vector<16x128xf32>
      %c0_25 = arith.constant 0 : index
      %c0_26 = arith.constant 0 : index
      %33 = vector.load %arg9[%c0_25, %c0_26] : memref<1x128xf32, #tpu.memory_space<vmem>>, vector<1x128xf32>
      %34 = vector.broadcast %33 : vector<1x128xf32> to vector<16x128xf32>
      %35 = arith.addf %32, %34 : vector<16x128xf32>
      %cst_27 = arith.constant 0.000000e+00 : f32
      %36 = vector.broadcast %cst_27 : f32 to vector<16x128xf32>
      %37 = arith.maximumf %35, %36 : vector<16x128xf32>
      %38 = arith.truncf %37 : vector<16x128xf32> to vector<16x128xbf16>
      %c0_28 = arith.constant 0 : index
      %c0_29 = arith.constant 0 : index
      %39 = vector.load %arg6[%c0_28, %c0_29] : memref<128x128xbf16, #tpu.memory_space<vmem>>, vector<128x128xbf16>
      %cst_30 = arith.constant dense<0.000000e+00> : vector<16x128xf32>
      %40 = tpu.matmul %38, %39, %cst_30 {dimension_numbers = #tpu.dot_dimension_numbers<[1], [0], [0], [1], [0, 0, 1, 1], [], []>} : vector<16x128xbf16>, vector<128x128xbf16>, vector<16x128xf32> -> vector<16x128xf32>
      %41 = vector.extract_strided_slice %27 {offsets = [0, 128], sizes = [16, 128], strides = [1, 1]} : vector<16x256xf32> to vector<16x128xf32>
      %42 = arith.addf %40, %41 : vector<16x128xf32>
      %c0_31 = arith.constant 0 : index
      %c0_32 = arith.constant 0 : index
      %43 = vector.load %arg10[%c0_31, %c0_32] : memref<1x128xf32, #tpu.memory_space<vmem>>, vector<1x128xf32>
      %44 = vector.broadcast %43 : vector<1x128xf32> to vector<16x128xf32>
      %45 = arith.addf %42, %44 : vector<16x128xf32>
      %cst_33 = arith.constant 0.000000e+00 : f32
      %46 = vector.broadcast %cst_33 : f32 to vector<16x128xf32>
      %47 = arith.maximumf %45, %46 : vector<16x128xf32>
      %48 = arith.truncf %47 : vector<16x128xf32> to vector<16x128xbf16>
      %c0_34 = arith.constant 0 : index
      %c0_35 = arith.constant 0 : index
      %49 = vector.load %arg13[%c0_34, %c0_35] : memref<16x128xbf16, #tpu.memory_space<vmem>>, vector<16x128xbf16>
      tpu.vector_store %arg13[%c0_34, %c0_35], %48 {strides = array<i32>} : memref<16x128xbf16, #tpu.memory_space<vmem>>, vector<16x128xbf16>,
    } else {
    }
    %c0 = arith.constant 0 : index
    %c0_1 = arith.constant 0 : index
    %3 = vector.load %arg13[%c0, %c0_1] : memref<16x128xbf16, #tpu.memory_space<vmem>>, vector<16x128xbf16>
    %c0_2 = arith.constant 0 : index
    %c0_3 = arith.constant 0 : index
    %4 = vector.load %arg7[%c0_2, %c0_3] : memref<128x128xbf16, #tpu.memory_space<vmem>>, vector<128x128xbf16>
    %cst = arith.constant dense<0.000000e+00> : vector<16x128xf32>
    %5 = tpu.matmul %3, %4, %cst {dimension_numbers = #tpu.dot_dimension_numbers<[1], [0], [0], [1], [0, 0, 1, 1], [], []>} : vector<16x128xbf16>, vector<128x128xbf16>, vector<16x128xf32> -> vector<16x128xf32>
    %c0_4 = arith.constant 0 : index
    %c0_5 = arith.constant 0 : index
    %6 = vector.load %arg11[%c0_4, %c0_5] : memref<1x128xf32, #tpu.memory_space<vmem>>, vector<1x128xf32>
    %7 = vector.broadcast %6 : vector<1x128xf32> to vector<16x128xf32>
    %8 = arith.addf %5, %7 : vector<16x128xf32>
    %9 = arith.cmpf one, %8, %8 : vector<16x128xf32>
    %cst_6 = arith.constant 0.000000e+00 : f32
    %10 = vector.broadcast %cst_6 : f32 to vector<16x128xf32>
    %11 = arith.select %9, %10, %8 : vector<16x128xi1>, vector<16x128xf32>
    %cst_7 = arith.constant -3.40282347E+38 : f32
    %cst_8 = arith.constant 3.40282347E+38 : f32
    %12 = vector.broadcast %cst_7 : f32 to vector<16x128xf32>
    %13 = arith.maximumf %12, %11 : vector<16x128xf32>
    %14 = vector.broadcast %cst_8 : f32 to vector<16x128xf32>
    %15 = arith.minimumf %14, %13 : vector<16x128xf32>
    %c0_9 = arith.constant 0 : index
    %c0_10 = arith.constant 0 : index
    %16 = vector.load %arg12[%c0_9, %c0_10] : memref<16x128xf32, #tpu.memory_space<vmem>>, vector<16x128xf32>
    tpu.vector_store %arg12[%c0_9, %c0_10], %15 {strides = array<i32>} : memref<16x128xf32, #tpu.memory_space<vmem>>, vector<16x128xf32>,
    return
  }
  func.func @transform_0(%arg0: i32, %arg1: i32) -> (i32, i32) {
    %c0_i32 = arith.constant 0 : i32
    %c0_i32_0 = arith.constant 0 : i32
    return %arg0, %c0_i32 : i32, i32
  }
  func.func @transform_1(%arg0: i32, %arg1: i32) -> (i32, i32) {
    %c0_i32 = arith.constant 0 : i32
    %c0_i32_0 = arith.constant 0 : i32
    %c0_i32_1 = arith.constant 0 : i32
    return %c0_i32, %c0_i32_0 : i32, i32
  }
  func.func @transform_2(%arg0: i32, %arg1: i32) -> (i32, i32) {
    %c0_i32 = arith.constant 0 : i32
    %c0_i32_0 = arith.constant 0 : i32
    %c0_i32_1 = arith.constant 0 : i32
    return %c0_i32, %c0_i32_0 : i32, i32
  }
  func.func @transform_3(%arg0: i32, %arg1: i32) -> (i32, i32) {
    %c0_i32 = arith.constant 0 : i32
    %c0_i32_0 = arith.constant 0 : i32
    %c0_i32_1 = arith.constant 0 : i32
    return %c0_i32, %c0_i32_0 : i32, i32
  }
  func.func @transform_4(%arg0: i32, %arg1: i32) -> (i32, i32) {
    %c0_i32 = arith.constant 0 : i32
    %c0_i32_0 = arith.constant 0 : i32
    %c0_i32_1 = arith.constant 0 : i32
    return %c0_i32, %c0_i32_0 : i32, i32
  }
  func.func @transform_5(%arg0: i32, %arg1: i32) -> (i32, i32) {
    %c0_i32 = arith.constant 0 : i32
    %c0_i32_0 = arith.constant 0 : i32
    return %c0_i32, %arg1 : i32, i32
  }
  func.func @transform_6(%arg0: i32, %arg1: i32) -> (i32, i32) {
    %c0_i32 = arith.constant 0 : i32
    %c0_i32_0 = arith.constant 0 : i32
    %c0_i32_1 = arith.constant 0 : i32
    return %c0_i32, %c0_i32_0 : i32, i32
  }
  func.func @transform_7(%arg0: i32, %arg1: i32) -> (i32, i32) {
    %c0_i32 = arith.constant 0 : i32
    %c0_i32_0 = arith.constant 0 : i32
    %c0_i32_1 = arith.constant 0 : i32
    return %c0_i32, %c0_i32_0 : i32, i32
  }
  func.func @transform_8(%arg0: i32, %arg1: i32) -> (i32, i32) {
    %c0_i32 = arith.constant 0 : i32
    %c0_i32_0 = arith.constant 0 : i32
    %c0_i32_1 = arith.constant 0 : i32
    return %c0_i32, %c0_i32_0 : i32, i32
  }
  func.func @transform_9(%arg0: i32, %arg1: i32) -> (i32, i32) {
    %c0_i32 = arith.constant 0 : i32
    %c0_i32_0 = arith.constant 0 : i32
    return %c0_i32, %arg1 : i32, i32
  }
  func.func @transform_10(%arg0: i32, %arg1: i32) -> (i32, i32) {
    %c0_i32 = arith.constant 0 : i32
    return %arg0, %arg1 : i32, i32
  }
}

</mosaic_0001>

<bundles_post_ra>
// kernel: encoder_decoder_forward.1
= control target key start
LH: loop header
LB: loop body
LE: loop exit
PB: predicated region body
PF: predicated region fallthrough
CT: control target
= control target key end

     0   :  { %s1968_s0 = inlined_call_operand.vmem [shape: bf16[48,256], index: 0, kind: input, shape index: {}]   ;;  %s1969_s1 = inlined_call_operand.vmem [shape: bf16[256,128], index: 1, kind: input, shape index: {}]   ;;  %s1970_s2 = inlined_call_operand.vmem [shape: bf16[128,256], index: 2, kind: input, shape index: {}]   ;;  %s1971_s3 = inlined_call_operand.hbm [shape: bf16[128,128], index: 3, kind: input, shape index: {}]   ;;  %s1972_s4 = inlined_call_operand.hbm [shape: bf16[128,128], index: 4, kind: input, shape index: {}]   ;;  %s1973_s5 = inlined_call_operand.hbm [shape: bf16[128,128], index: 5, kind: input, shape index: {}]   ;;  %s1974_s6 = inlined_call_operand.vmem [shape: f32[1,128], index: 6, kind: input, shape index: {}]   ;;  %s1975_s7 = inlined_call_operand.vmem [shape: f32[1,128], index: 7, kind: input, shape index: {}]   ;;  %s1976_s8 = inlined_call_operand.vmem [shape: f32[1,128], index: 8, kind: input, shape index: {}]   ;;  %s1977_s9 = inlined_call_operand.vmem [shape: f32[1,128], index: 9, kind: input, shape index: {}]   ;;  %s1978_s10 = inlined_call_operand.vmem [shape: f32[48,128], index: 10, kind: output, shape index: {}]  }
   0x1   :  { %1979 = sst [smem:[#allocation10_spill]] %s1972_s4 }
   0x2   :  { %15 = vsyncpa [#allocation4], 0 }
   0x3   :  { %16 = vsyncpa [#allocation6], 0  ;;  %s1722_s13 = smov 0   ;;  %s1724_s14 = smov 0  }
   0x4   :  { %s1726_s15 = smov 0  }
   0x5 LB: > { %s1157_s16 = sadd.s32 4294967295, %s1660_s15   ;;  %p1159_p0 = scmp.ge.s32.totalorder %s1660_s15, 1  ;;  %s1660_s15 = sphi %s1726_s15, %s22_s15   ;;  %s1656_s14 = sphi %s1724_s14, %s1985_s14   ;;  %s1652_s13 = sphi %s1722_s13, %s1984_s13  }
   0x6   : > { %p292_p1 = scmp.lt.s32.totalorder %s1660_s15, 4  ;;  %p1740_p2 = scmp.eq.s32.totalorder %s1157_s16, 0 }
   0x7   : > { %s1981_s4 = sld [smem:[#allocation10_spill]]  ;;  %s1662_s22 = smov [#allocation5]  }
   0x8   : > { %p1747_p3 = pnand %p1159_p0, %p292_p1  ;;  %s325_s23 = sshll.u32 %s1662_s22, 4  ;;  %s326_s23 = int_to_ptr.vmem [resolvable:$true] %s325_s23 }
   0x9   : > { %s34_s25 = sadd.s32 1, %s1656_s14  ;;  %s1663_s26 = smov 64  }
   0xa   : > { %p1491_p4 = pneg %p1747_p3  ;;  %p36_p6 = scmp.ge.s32.totalorder %s34_s25, 3 }
   0xb   : > { %s1664_s27 = smov 4   ;;  %s309_s30 = sshll.u32 %s1971_s3, 4  ;;  %s310_s30 = int_to_ptr.hbm [resolvable:$true] %s309_s30 }
   0xc   : > { %p1755_p5 = pnand %p1740_p2, %p1491_p4  ;;  %s1987_s25 = smov (%p36_p6, %s34_s25), 0 }
   0xd   : > { %s323_s20 = sshll.u32 %s1981_s4, 4  ;;  %s1665_s11 = smov [#allocation3]   ;;  %s324_s20 = int_to_ptr.hbm [resolvable:$true] %s323_s20 }
   0xe   : > { %1497 = dma.hbm_to_vmem [thread:$0]  (!%p1755_p5), %s324_s20, 1024, %s326_s23, [#allocation6], %s1663_s26, %s1663_s26, %s1664_s27  }
   0xf   : > { %s311_s12 = sshll.u32 %s1665_s11, 4  ;;  %s339_s19 = sshll.u32 %s1973_s5, 4  ;;  %s312_s12 = int_to_ptr.vmem [resolvable:$true] %s311_s12  ;;  %s340_s19 = int_to_ptr.hbm [resolvable:$true] %s339_s19 }
  0x10   : > { %1494 = dma.hbm_to_vmem [thread:$0]  (!%p1755_p5), %s310_s30, 1024, %s312_s12, [#allocation4], %s1663_s26, %s1663_s26, %s1664_s27  }
  0x11   : > { %s1666_s22 = smov [#allocation7]   ;;  %382 = sbr.rel (%p1747_p3) target bundleno = 638 (0x27e), region = 60 }
  0x12   : > { %s341_s4 = sshll.u32 %s1666_s22, 4  ;;  %s342_s4 = int_to_ptr.vmem [resolvable:$true] %s341_s4 }
  0x13   : > { %1500 = dma.hbm_to_vmem [thread:$0]  (!%p1755_p5), %s340_s19, 1024, %s342_s4, [#allocation6], %s1663_s26, %s1663_s26, %s1664_s27  }
  0x16   : > { %1643 = dma.done.wait (%p1740_p2), [#allocation4], 1024  }
  0x17   : > { %1645 = vsyncadd (%p1740_p2), [#allocation4], 4294966272 }
  0x18   : > { %1647 = dma.done.wait (%p1740_p2), [#allocation6], 2048  }
  0x19   : > { %1649 = vsyncadd (%p1740_p2), [#allocation6], 4294965248  ;;  %v1424_v0 = vld [vmem:[%s1969_s1 + $0x38] sm:$0xff]  ;;  %v1423_v2 = vld [vmem:[%s1969_s1 + $0x30] sm:$0xff]  ;;  %s1169_s22 = sshll.u32 %s1652_s13, 1 }
  0x1a   : > { %v1432_v1 = vld [vmem:[%s1969_s1 + $0x78] sm:$0xff]  ;;  %605 = vmatpush.bf16.msra.mxu0 %v1424_v0  ;;  %v1431_v3 = vld [vmem:[%s1969_s1 + $0x70] sm:$0xff]  ;;  %v1422_v4 = vld [vmem:[%s1969_s1 + $0x28] sm:$0xff]  ;;  %p439_p7 = scmp.lt.s32.totalorder %s1169_s22, 5 }
  0x1b   : > { %619 = vmatpush.bf16.msra.mxu1 %v1432_v1  ;;  %v1430_v5 = vld [vmem:[%s1969_s1 + $0x68] sm:$0xff]  ;;  %v1304_v6 = vld [vmem:[%s1970_s2 + $0x70] sm:$0xf]  ;;  %v1448_v7 = vld [vmem:[%s1970_s2 + $0x74] sm:$0xf0] }
  0x1c   : > { %v1305_v8 = vor.u32 %v1448_v7, %v1304_v6  ;;  %v1296_v9 = vld [vmem:[%s1970_s2 + $0x60] sm:$0xf]  ;;  %v1446_v10 = vld [vmem:[%s1970_s2 + $0x64] sm:$0xf0]  ;;  %v1288_v14 = vld [vmem:[%s1970_s2 + $0x50] sm:$0xf] }
  0x1d   : > { %v1421_v11 = vld [vmem:[%s1969_s1 + $0x20] sm:$0xff]  ;;  %v1297_v13 = vor.u32 %v1446_v10, %v1296_v9  ;;  %v1444_v15 = vld [vmem:[%s1970_s2 + $0x54] sm:$0xf0]  ;;  %s1989_s22 = smov (!%p439_p7, %s1169_s22), 5  ;;  %v1442_v20 = vld [vmem:[%s1970_s2 + $0x44] sm:$0xf0] }
  0x1e   : > { %606 = vmatpush.bf16.msra.mxu0 %v1423_v2  ;;  %v1429_v12 = vld [vmem:[%s1969_s1 + $0x60] sm:$0xff]  ;;  %731 = vmatpush.bf16.msra.mxu2 %v1305_v8  ;;  %v1420_v16 = vld [vmem:[%s1969_s1 + $0x18] sm:$0xff]  ;;  %v1289_v18 = vor.u32 %v1444_v15, %v1288_v14  ;;  %v1419_v21 = vld [vmem:[%s1969_s1 + $0x10] sm:$0xff]  ;;  %s1414_s28 = sshll.u32 %s1989_s22, 3 }
  0x1f   : > { %620 = vmatpush.bf16.msra.mxu1 %v1431_v3  ;;  %v1428_v17 = vld [vmem:[%s1969_s1 + $0x58] sm:$0xff]  ;;  %v1280_v19 = vld [vmem:[%s1970_s2 + $0x40] sm:$0xf]  ;;  %v1427_v22 = vld [vmem:[%s1969_s1 + $0x50] sm:$0xff]  ;;  %s443_s23 = scalar_lea.vmem %s1968_s0, %s1414_s28  ;;  %s455_s12 = scalar_lea.vmem %s1978_s10, %s1414_s28 }
  0x20   : > { %v1281_v23 = vor.u32 %v1442_v20, %v1280_v19  ;;  %v1272_v24 = vld [vmem:[%s1970_s2 + $0x30] sm:$0xf]  ;;  %v1440_v25 = vld [vmem:[%s1970_s2 + $0x34] sm:$0xf0]  ;;  %v1418_v26 = vld [vmem:[%s1969_s1 + $0x8] sm:$0xff] }
  0x21   : > { %v1426_v27 = vld [vmem:[%s1969_s1 + $0x48] sm:$0xff]  ;;  %v1273_v28 = vor.u32 %v1440_v25, %v1272_v24  ;;  %v1264_v29 = vld [vmem:[%s1970_s2 + $0x20] sm:$0xf]  ;;  %v1415_v35 = vld [vmem:[%s443_s23 + $0x4] sm:$0xf] }
  0x22   : > { %607 = vmatpush.bf16.msra.mxu0 %v1422_v4  ;;  %732 = vmatpush.bf16.msra.mxu2 %v1297_v13  ;;  %v1438_v30 = vld [vmem:[%s1970_s2 + $0x24] sm:$0xf0]  ;;  %v1417_v31 = vld [vmem:[%s1969_s1] sm:$0xff]  ;;  %v1178_v36 = vld [vmem:[%s443_s23 + $0x8] sm:$0xf0] }
  0x23   : > { %621 = vmatpush.bf16.msra.mxu1 %v1430_v5  ;;  %v1425_v32 = vld [vmem:[%s1969_s1 + $0x40] sm:$0xff]  ;;  %v1416_v34 = vld [vmem:[%s443_s23 + $0x4] sm:$0xf0]  ;;  %v1265_v38 = vor.u32 %v1438_v30, %v1264_v29  ;;  %v1256_v39 = vld [vmem:[%s1970_s2 + $0x10] sm:$0xf]  ;;  %v1181_v42 = vor.u32 %v1415_v35, %v1178_v36 }
  0x24   : > { %v1176_v33 = vld [vmem:[%s443_s23] sm:$0xf]  ;;  %v1436_v40 = vld [vmem:[%s1970_s2 + $0x14] sm:$0xf0]  ;;  %v1454_v45 = vld [vmem:[#allocation3 + $0x28] sm:$0xff] }
  0x25   : > { %v1456_v37 = vld [vmem:[#allocation3 + $0x38] sm:$0xff]  ;;  %v1883_v41 = vor.u32 %v1416_v34, %v1176_v33  ;;  %v1455_v43 = vld [vmem:[#allocation3 + $0x30] sm:$0xff]  ;;  %v1257_v44 = vor.u32 %v1436_v40, %v1256_v39  ;;  %v1453_v46 = vld [vmem:[#allocation3 + $0x20] sm:$0xff] }
  0x26   : > { %608 = vmatpush.bf16.msra.mxu0 %v1421_v11  ;;  %733 = vmatpush.bf16.msra.mxu2 %v1289_v18  ;;  %v1248_v47 = vld [vmem:[%s1970_s2] sm:$0xf]  ;;  %v1434_v48 = vld [vmem:[%s1970_s2 + $0x4] sm:$0xf0]  ;;  %v1451_v51 = vld [vmem:[#allocation3 + $0x10] sm:$0xff] }
  0x27   : > { %622 = vmatpush.bf16.msra.mxu1 %v1429_v12  ;;  %v1249_v49 = vor.u32 %v1434_v48, %v1248_v47  ;;  %v1452_v50 = vld [vmem:[#allocation3 + $0x18] sm:$0xff]  ;;  %v1450_v52 = vld [vmem:[#allocation3 + $0x8] sm:$0xff]  ;;  %v1449_v53 = vld [vmem:[#allocation3] sm:$0xff] }
  0x28   : > { %v1447_v54 = vld [vmem:[%s1970_s2 + $0x74] sm:$0xf]  ;;  %v1306_v55 = vld [vmem:[%s1970_s2 + $0x78] sm:$0xf0]  ;;  %v1445_v56 = vld [vmem:[%s1970_s2 + $0x64] sm:$0xf] }
  0x29   : > { %v1309_v57 = vor.u32 %v1447_v54, %v1306_v55  ;;  %v1298_v58 = vld [vmem:[%s1970_s2 + $0x68] sm:$0xf0]  ;;  %v1464_v59 = vld [vmem:[#allocation5 + $0x38] sm:$0xff]  ;;  %v1443_v61 = vld [vmem:[%s1970_s2 + $0x54] sm:$0xf] }
  0x2a   : > { %609 = vmatpush.bf16.msra.mxu0 %v1420_v16  ;;  %734 = vmatpush.bf16.msra.mxu2 %v1281_v23  ;;  %v1301_v60 = vor.u32 %v1445_v56, %v1298_v58  ;;  %v1290_v62 = vld [vmem:[%s1970_s2 + $0x58] sm:$0xf0]  ;;  %v1441_v1 = vld [vmem:[%s1970_s2 + $0x44] sm:$0xf]  ;;  %v1282_v2 = vld [vmem:[%s1970_s2 + $0x48] sm:$0xf0] }
  0x2b   : > { %623 = vmatpush.bf16.msra.mxu1 %v1428_v17  ;;  %745 = vmatpush.bf16.msra.mxu3 %v1309_v57  ;;  %v1463_v63 = vld [vmem:[#allocation5 + $0x30] sm:$0xff]  ;;  %v1293_v0 = vor.u32 %v1443_v61, %v1290_v62  ;;  %v1285_v3 = vor.u32 %v1441_v1, %v1282_v2  ;;  %v1439_v4 = vld [vmem:[%s1970_s2 + $0x34] sm:$0xf]  ;;  %v1536_v9 = vld [vmem:[%s1974_s6] ss:$0 sm:$0xff] }
  0x2c   : > { %v1274_v5 = vld [vmem:[%s1970_s2 + $0x38] sm:$0xf0]  ;;  %v1437_v19 = vld [vmem:[%s1970_s2 + $0x24] sm:$0xf]  ;;  %v1266_v20 = vld [vmem:[%s1970_s2 + $0x28] sm:$0xf0] }
  0x2d   : > { %v1277_v8 = vor.u32 %v1439_v4, %v1274_v5  ;;  %v1435_v23 = vld [vmem:[%s1970_s2 + $0x14] sm:$0xf]  ;;  %v1258_v24 = vld [vmem:[%s1970_s2 + $0x18] sm:$0xf0]  ;;  %v1461_v25 = vld [vmem:[#allocation5 + $0x20] sm:$0xff] }
  0x2e   : > { %610 = vmatpush.bf16.msra.mxu0 %v1419_v21  ;;  %735 = vmatpush.bf16.msra.mxu2 %v1273_v28  ;;  %v1462_v21 = vld [vmem:[#allocation5 + $0x28] sm:$0xff]  ;;  %v1250_v28 = vld [vmem:[%s1970_s2 + $0x8] sm:$0xf0]  ;;  %v1460_v30 = vld [vmem:[#allocation5 + $0x18] sm:$0xff] }
  0x2f   : > { %624 = vmatpush.bf16.msra.mxu1 %v1427_v22  ;;  %746 = vmatpush.bf16.msra.mxu3 %v1301_v60  ;;  %v1269_v22 = vor.u32 %v1437_v19, %v1266_v20  ;;  %v1457_v33 = vld [vmem:[#allocation5] sm:$0xff]  ;;  %v1472_v47 = vld [vmem:[#allocation7 + $0x30] sm:$0xff]  ;;  %v1471_v48 = vld [vmem:[#allocation7 + $0x28] sm:$0xff] }
  0x30   : > { %v1538_v57 = vld [vmem:[%s1976_s8] ss:$0 sm:$0xff] }
  0x32   : > { %611 = vmatpush.bf16.msra.mxu0 %v1418_v26  ;;  %736 = vmatpush.bf16.msra.mxu2 %v1265_v38  ;;  %v1261_v26 = vor.u32 %v1435_v23, %v1258_v24 }
  0x33   : > { %625 = vmatpush.bf16.msra.mxu1 %v1426_v27  ;;  %747 = vmatpush.bf16.msra.mxu3 %v1293_v0  ;;  %v1433_v27 = vld [vmem:[%s1970_s2 + $0x4] sm:$0xf] }
  0x34   : > { %v1253_v29 = vor.u32 %v1433_v27, %v1250_v28 }
  0x36   : > { %612 = vmatpush.bf16.msra.mxu0 %v1417_v31  ;;  %737 = vmatpush.bf16.msra.mxu2 %v1257_v44  ;;  %v1459_v31 = vld [vmem:[#allocation5 + $0x10] sm:$0xff] }
  0x37   : > { %626 = vmatpush.bf16.msra.mxu1 %v1425_v32  ;;  %748 = vmatpush.bf16.msra.mxu3 %v1285_v3  ;;  %v1458_v32 = vld [vmem:[#allocation5 + $0x8] sm:$0xff]  ;;  %v1539_v3 = vld [vmem:[%s1977_s9] ss:$0 sm:$0xff] }
  0x39   : > { %613 = vmatmul.bf16.vlgmr.msra.gmra.mxu0 %v1883_v41 }
  0x3a   : > { %824 = vmatpush.bf16.msrb.mxu0 %v1456_v37  ;;  %627 = vmatmul.bf16.vlgmr.msra.gmra.mxu1 %v1181_v42  ;;  %v1537_v37 = vld [vmem:[%s1975_s7] ss:$0 sm:$0xff] }
  0x3b   : > { %738 = vmatpush.bf16.msra.mxu2 %v1249_v49  ;;  %911 = vmatpush.bf16.msrb.mxu1 %v1464_v59  ;;  %v1470_v49 = vld [vmem:[#allocation7 + $0x20] sm:$0xff] }
  0x3c   : > { %749 = vmatpush.bf16.msra.mxu3 %v1277_v8 }
  0x3e   : > { %825 = vmatpush.bf16.msrb.mxu0 %v1455_v43  ;;  %739 = vmatmul.bf16.vlgmr.msra.gmra.mxu2 %v1883_v41 }
  0x3f   : > { %912 = vmatpush.bf16.msrb.mxu1 %v1463_v63 }
  0x40   : > { %750 = vmatpush.bf16.msra.mxu3 %v1269_v22 }
  0x42   : > { %826 = vmatpush.bf16.msrb.mxu0 %v1454_v45 }
  0x43   : > { %913 = vmatpush.bf16.msrb.mxu1 %v1462_v21 }
  0x44   : > { %751 = vmatpush.bf16.msra.mxu3 %v1261_v26 }
  0x46   : > { %827 = vmatpush.bf16.msrb.mxu0 %v1453_v46  ;;  %v1473_v46 = vld [vmem:[#allocation7 + $0x38] sm:$0xff] }
  0x47   : > { %914 = vmatpush.bf16.msrb.mxu1 %v1461_v25  ;;  %1013 = vmatpush.bf16.msrb.mxu2 %v1473_v46 }
  0x48   : > { %752 = vmatpush.bf16.msra.mxu3 %v1253_v29 }
  0x4a   : > { %828 = vmatpush.bf16.msrb.mxu0 %v1452_v50  ;;  %v1469_v50 = vld [vmem:[#allocation7 + $0x18] sm:$0xff] }
  0x4b   : > { %753 = vmatmul.bf16.vlgmr.msra.gmra.mxu3 %v1883_v41  ;;  %915 = vmatpush.bf16.msrb.mxu1 %v1460_v30 }
  0x4c   : > { %1014 = vmatpush.bf16.msrb.mxu2 %v1472_v47 }
  0x4e   : > { %829 = vmatpush.bf16.msrb.mxu0 %v1451_v51  ;;  %v1468_v51 = vld [vmem:[#allocation7 + $0x10] sm:$0xff] }
  0x4f   : > { %916 = vmatpush.bf16.msrb.mxu1 %v1459_v31 }
  0x50   : > { %1015 = vmatpush.bf16.msrb.mxu2 %v1471_v48 }
  0x52   : > { %830 = vmatpush.bf16.msrb.mxu0 %v1450_v52  ;;  %v1467_v52 = vld [vmem:[#allocation7 + $0x8] sm:$0xff] }
  0x53   : > { %917 = vmatpush.bf16.msrb.mxu1 %v1458_v32 }
  0x54   : > { %1016 = vmatpush.bf16.msrb.mxu2 %v1470_v49 }
  0x56   : > { %831 = vmatpush.bf16.msrb.mxu0 %v1449_v53  ;;  %v1466_v53 = vld [vmem:[#allocation7] sm:$0xff] }
  0x57   : > { %918 = vmatpush.bf16.msrb.mxu1 %v1457_v33 }
  0x58   : > { %1017 = vmatpush.bf16.msrb.mxu2 %v1469_v50 }
  0x5c   : > { %1018 = vmatpush.bf16.msrb.mxu2 %v1468_v51 }
  0x60   : > { %1019 = vmatpush.bf16.msrb.mxu2 %v1467_v52 }
  0x64   : > { %1020 = vmatpush.bf16.msrb.mxu2 %v1466_v53 }
  0xb6   : > { %v614_v6 = vpop.f32.mrf.mxu0 }
  0xb7   : > { %v628_v7 = vpop.f32.mrf.mxu1  ;;  %v615_v10 = vadd.f32 %v1536_v9, %v614_v6 }
  0xb9   : > { %v629_v12 = vadd.f32 %v628_v7, %v615_v10 }
  0xbb   : > { %v633_v16 = vmax.f32 %v629_v12, 0.0 }
  0xbe   : > { %v616_v11 = vpop.f32.mrf.mxu0 }
  0xbf   : > { %v617_v13 = vadd.f32 %v1536_v9, %v616_v11  ;;  %v630_v14 = vpop.f32.mrf.mxu1 }
  0xc1   : > { %v631_v15 = vadd.f32 %v630_v14, %v617_v13  ;;  %v740_v34 = vpop.f32.mrf.mxu2 }
  0xc3   : > { %v634_v17 = vmax.f32 %v631_v15, 0.0 }
  0xc5   : > { %v759_v18 = vpack.c.bf16 %v634_v17, %v633_v16 }
  0xc7   : > { %832 = vmatmul.bf16.vlgmr.msrb.gmra.mxu0 %v759_v18 }
  0xc9   : > { %v742_v38 = vpop.f32.mrf.mxu2 }
  0xce   : > { %v754_v54 = vpop.f32.mrf.mxu3 }
  0xd6   : > { %v756_v58 = vpop.f32.mrf.mxu3 }
 0x144   : > { %v833_v35 = vpop.f32.mrf.mxu0 }
 0x145   : > { %v834_v36 = vadd.f32 %v833_v35, %v740_v34 }
 0x147   : > { %v842_v40 = vadd.f32 %v1537_v37, %v834_v36 }
 0x149   : > { %v844_v43 = vmax.f32 %v842_v40, 0.0 }
 0x14c   : > { %v835_v39 = vpop.f32.mrf.mxu0 }
 0x14d   : > { %v836_v42 = vadd.f32 %v835_v39, %v742_v38 }
 0x14f   : > { %v843_v41 = vadd.f32 %v1537_v37, %v836_v42 }
 0x151   : > { %v845_v44 = vmax.f32 %v843_v41, 0.0 }
 0x153   : > { %v846_v45 = vpack.c.bf16 %v845_v44, %v844_v43 }
 0x155   : > { %919 = vmatmul.bf16.vlgmr.msrb.gmra.mxu1 %v846_v45 }
 0x1d2   : > { %v920_v55 = vpop.f32.mrf.mxu1 }
 0x1d3   : > { %v921_v56 = vadd.f32 %v920_v55, %v754_v54 }
 0x1d5   : > { %v929_v60 = vadd.f32 %v1538_v57, %v921_v56 }
 0x1d7   : > { %v931_v63 = vmax.f32 %v929_v60, 0.0 }
 0x1da   : > { %v922_v59 = vpop.f32.mrf.mxu1 }
 0x1db   : > { %v923_v61 = vadd.f32 %v922_v59, %v756_v58 }
 0x1dd   : > { %v930_v62 = vadd.f32 %v1538_v57, %v923_v61 }
 0x1df   : > { %v932_v0 = vmax.f32 %v930_v62, 0.0 }
 0x1e1   : > { %v1477_v1 = vpack.c.bf16 %v932_v0, %v931_v63 }
 0x1e3   : > { %1478 = vst [vmem:[#allocation2] sm:$0xff] %v1477_v1  }
 0x1ea   : > { %v1465_v2 = vld [vmem:[#allocation2] sm:$0xff] }
 0x1eb   : > { %1021 = vmatmul.bf16.vlgmr.msrb.gmra.mxu2 %v1465_v2 }
 0x26e   : > { %v1022_v4 = vpop.f32.mrf.mxu2 }
 0x26f   : > { %v1023_v5 = vadd.f32 %v1539_v3, %v1022_v4 }
 0x271   : > { %vm1027_vm0 = vcmp.ne.f32.partialorder %v1023_v5, %v1023_v5 }
 0x272   : > { %v1029_v6 = vsel %vm1027_vm0, 0.0, %v1023_v5 }
 0x273   : > { %v1410_v7 = vclamps-f32 %v1029_v6, 3.4028235e+38 }
 0x275   : > { %1035 = vst [vmem:[%s455_s12] sm:$0xff] %v1410_v7 }
 0x276   : > { %v1024_v8 = vpop.f32.mrf.mxu2 }
 0x277   : > { %v1025_v9 = vadd.f32 %v1539_v3, %v1024_v8 }
 0x279   : > { %vm1028_vm1 = vcmp.ne.f32.partialorder %v1025_v9, %v1025_v9 }
 0x27a   : > { %v1030_v10 = vsel %vm1028_vm1, 0.0, %v1025_v9 }
 0x27b   : > { %v1411_v11 = vclamps-f32 %v1030_v10, 3.4028235e+38 }
 0x27d   : > { %1036 = vst [vmem:[%s455_s12 + $0x8] sm:$0xff] %v1411_v11 }
 0x27e PF: > { %s22_s15 = sadd.s32 1, %s1660_s15   ;;  %s1984_s13 = smov %s1656_s14 }
 0x27f   : > { %p19_p8 = scmp.ge.s32.totalorder %s22_s15, 5   ;;  %s1985_s14 = smov %s1987_s25 }
 0x281   :  { %21 = sbr.rel (!%p19_p8) target bundleno = 5 (0x5), region = 111 }
 0x286   :  { %1065 = vsyncpa [#allocation4], 1 }
 0x287   :  { %1067 = vsyncpa [#allocation4 + $0x1], 1 }
 0x288   :  { %1068 = vsyncpa [#allocation6], 1 }

</bundles_post_ra>
